<compile_context>
chip_gen: v7x
topology: tpu7x:2x2x1
jax: 0.10.0
libtpu: 0.0.40
codegen_flags: <defaults>
</compile_context>

<pallas_src>
import jax
import jax.numpy as jnp
import numpy as np
from jax.experimental import pallas as pl
from jax.experimental.pallas import tpu as pltpu

EPS = 1e-5

# bf16 MXU operands (native on v5e/v6e/v7x) and bf16 inter-pass activations
# (halves HBM traffic of the memory-bound passes).  Accumulation, BN stats and
# the final output stay f32.
MXU_DTYPE = jnp.bfloat16
ACT_DTYPE = jnp.bfloat16


# --------------------------- pass 1: convs + BN stats ------------------------
def _conv_stats_kernel(x_ref, w1_ref, b1_ref, w2_ref, h_ref, z_ref, stat_ref):
    # x_ref:    (NB, H, W*Cin)        NB images, lane-dense slab layout (bf16)
    # w1_ref:   (W*Cin, W*Cout)       block-diagonal 1x1-conv weight (bf16)
    # b1_ref:   (1, W*Cout)           conv1 bias tiled across W (f32)
    # w2_ref:   (3, W*Cout, W*Cout)   banded 3x3-conv weight, one band per ky (bf16)
    # h_ref:    (NB, H, W*Cout)       conv1 + ReLU (identity branch), bf16
    # z_ref:    (NB, H, W*Cout)       conv2 output, bf16 (no b2: BN mean cancels it)
    # stat_ref: (1, 2, W*Cout)        per-block [sum, sum_sq] of f32 z over NB*H rows
    NB, H, WCin = x_ref.shape
    WC = w1_ref.shape[1]

    # ---- conv1 (1x1) + ReLU: one lane-dense matmul with M = NB*H ------------
    x = x_ref[...].reshape(NB * H, WCin)                       # bf16
    h = jnp.dot(x, w1_ref[...], preferred_element_type=jnp.float32)   # (NB*H, WC) f32
    h = jnp.maximum(h + b1_ref[...], 0.0)
    h3 = h.reshape(NB, H, WC)
    h_ref[...] = h3.astype(h_ref.dtype)

    # ---- conv2 (3x3, stride 1, pad 1): three accumulated matmuls ------------
    # H-direction neighbours are built PER IMAGE (axis 1) so rows never bleed
    # across image boundaries; W-direction padding / dx shifts are baked into
    # the banded weight.  No (H, 3*WC) concatenated temporary is materialized.
    zrow = jnp.zeros((NB, 1, WC), jnp.float32)
    up3 = jnp.concatenate([zrow, h3[:, :H - 1, :]], axis=1)    # row r -> h[r-1]
    down3 = jnp.concatenate([h3[:, 1:, :], zrow], axis=1)      # row r -> h[r+1]

    hb = h3.astype(MXU_DTYPE).reshape(NB * H, WC)
    up = up3.astype(MXU_DTYPE).reshape(NB * H, WC)
    down = down3.astype(MXU_DTYPE).reshape(NB * H, WC)

    z = jnp.dot(up, w2_ref[0], preferred_element_type=jnp.float32)
    z = z + jnp.dot(hb, w2_ref[1], preferred_element_type=jnp.float32)
    z = z + jnp.dot(down, w2_ref[2], preferred_element_type=jnp.float32)
    # TODO(synk): on v5e at large W/Cout the banded weight wastes ~W/3 of the
    # MXU flops; exploit the block-tridiagonal structure (per-dx sub-blocks)
    # once the kernel becomes MXU-bound there.

    z_ref[...] = z.reshape(NB, H, WC).astype(z_ref.dtype)

    # ---- partial BatchNorm statistics (from the f32 z, before the downcast) -
    s = jnp.sum(z, axis=0, keepdims=True)                      # (1, WC)
    ss = jnp.sum(z * z, axis=0, keepdims=True)                 # (1, WC)
    stat_ref[0] = jnp.concatenate([s, ss], axis=0)             # (2, WC)


# ------------------ pass 2: fused BN + FiLM + ReLU + residual ----------------
def _bn_film_residual_kernel(z_ref, h_ref, scale_ref, bias_ref, out_ref):
    # z/h: (NB, H, W*Cout) bf16; scale/bias: (NB, 1, W*Cout) f32; out: f32.
    z = z_ref[...].astype(jnp.float32)
    y = z * scale_ref[...] + bias_ref[...]
    out_ref[...] = jnp.maximum(y, 0.0) + h_ref[...].astype(jnp.float32)


# ------------------------------- host-side glue ------------------------------
def prepare_resblock_params(w1_oihw, b1, w2_oihw, b2, bn_w, bn_b, W):
    """One-time host-side repacking of the module weights for slab-layout matmuls."""
    w1 = np.asarray(w1_oihw, np.float32)          # (Cout, Cin, 1, 1)
    w2 = np.asarray(w2_oihw, np.float32)          # (Cout, Cout, 3, 3)
    Cout, Cin = w1.shape[0], w1.shape[1]
    WC = W * Cout

    # conv1 1x1 -> block-diagonal (W*Cin, W*Cout)
    w1bd = np.zeros((W * Cin, WC), np.float32)
    for w in range(W):
        w1bd[w * Cin:(w + 1) * Cin, w * Cout:(w + 1) * Cout] = w1[:, :, 0, 0].T

    # conv2 3x3 -> banded (3, W*Cout, W*Cout); band ky in {0,1,2} = dy -1/0/+1,
    # dx shifts and W-edge zero padding encoded in the band structure.
    w2band = np.zeros((3, WC, WC), np.float32)
    for ky in range(3):
        for dx in (-1, 0, 1):
            for w in range(W):
                ws = w + dx
                if 0 <= ws < W:
                    w2band[ky, ws * Cout:(ws + 1) * Cout, w * Cout:(w + 1) * Cout] = \
                        w2[:, :, ky, dx + 1].T

    return {
        # MXU operands pre-cast host-side: no per-grid-step VPU cast in-kernel.
        "w1bd": jnp.asarray(w1bd, MXU_DTYPE),
        "w2band": jnp.asarray(w2band, MXU_DTYPE),
        "b1": jnp.asarray(np.tile(np.asarray(b1, np.float32), W).reshape(1, WC)),
        # b2 is intentionally unused: BatchNorm (batch stats / training mode)
        # subtracts the batch mean, which cancels any constant per-channel bias.
        "b2": jnp.asarray(np.asarray(b2, np.float32)),
        "bn_w": jnp.asarray(np.asarray(bn_w, np.float32)),
        "bn_b": jnp.asarray(np.asarray(bn_b, np.float32)),
    }


def _pick_nb(N, H, WC, itemsize, budget=4 << 20):
    """Largest divisor of N whose (NB, H, WC) activation block stays <= budget."""
    best = 1
    for nb in range(1, N + 1):
        if N % nb == 0 and nb * H * WC * itemsize <= budget:
            best = nb
    return best


def _vmem_limit(blocks, headroom=3.0, cap=48 << 20):
    """Footprint-derived VMEM limit: 2x (double-buffered) blocks + temporaries.

    Capped at 48 MiB so it is always safe on v7x (64 MiB physical VMEM);
    v5e/v6e have 128 MiB so the cap is never the binding constraint there.
    """
    tot = 0
    for shape, dtype in blocks:
        tot += 2 * int(np.prod(shape)) * jnp.dtype(dtype).itemsize
    tot = int(headroom * tot)
    return int(min(max(tot, 8 << 20), cap))


def resblock_forward_slab(x_slab, beta, gamma, params):
    """Slab-layout entry point. x_slab: (N, H, W*Cin); beta/gamma: (N, Cout).

    Returns (N, H, W*Cout) f32 in slab layout (lane index = w*Cout + c).
    Keeping the surrounding model in this layout avoids NCHW<->slab transposes.
    """
    N, H, WCin = x_slab.shape
    WC = params["w1bd"].shape[1]
    Cout = params["bn_w"].shape[0]
    W = WC // Cout

    x_slab = x_slab.astype(ACT_DTYPE)
    NB = _pick_nb(N, H, WC, jnp.dtype(ACT_DTYPE).itemsize)
    nblk = N // NB

    # ---- pass 1: conv1 + conv2 + partial BN stats (grid over image blocks) --
    p1_blocks = [((NB, H, WCin), ACT_DTYPE), ((WCin, WC), MXU_DTYPE),
                 ((1, WC), jnp.float32), ((3, WC, WC), MXU_DTYPE),
                 ((NB, H, WC), ACT_DTYPE), ((NB, H, WC), ACT_DTYPE),
                 ((1, 2, WC), jnp.float32)]
    # TODO(synk): for large W*Cout on v7x, mark the weight BlockSpecs
    # pipeline_mode=pl.Buffered(1) and tile conv2's K per ky to bound the
    # resident banded-weight footprint (it scales as (W*Cout)^2).
    h_full, z_full, stats = pl.pallas_call(
        _conv_stats_kernel,
        out_shape=(jax.ShapeDtypeStruct((N, H, WC), ACT_DTYPE),
                   jax.ShapeDtypeStruct((N, H, WC), ACT_DTYPE),
                   jax.ShapeDtypeStruct((nblk, 2, WC), jnp.float32)),
        grid=(nblk,),
        in_specs=[
            pl.BlockSpec((NB, H, WCin), lambda n: (n, 0, 0)),
            pl.BlockSpec((WCin, WC), lambda n: (0, 0)),
            pl.BlockSpec((1, WC), lambda n: (0, 0)),
            pl.BlockSpec((3, WC, WC), lambda n: (0, 0, 0)),
        ],
        out_specs=(
            pl.BlockSpec((NB, H, WC), lambda n: (n, 0, 0)),
            pl.BlockSpec((NB, H, WC), lambda n: (n, 0, 0)),
            pl.BlockSpec((1, 2, WC), lambda n: (n, 0, 0)),
        ),
        compiler_params=pltpu.CompilerParams(
            dimension_semantics=("parallel",),
            vmem_limit_bytes=_vmem_limit(p1_blocks)),
    )(x_slab, params["w1bd"], params["b1"], params["w2band"])

    # ---- finish BN stats; fold BN affine + FiLM into per-(n, c) scale/bias --
    # Tiny (Cout,)-sized reduction; done in plain JAX between the two passes.
    cnt = float(N * H * W)
    s = stats[:, 0, :].reshape(nblk, W, Cout).sum(axis=(0, 1))        # (Cout,)
    ss = stats[:, 1, :].reshape(nblk, W, Cout).sum(axis=(0, 1))       # (Cout,)
    mean = s / cnt
    var = jnp.maximum(ss / cnt - mean * mean, 0.0)                    # biased batch var
    inv = jax.lax.rsqrt(var + EPS)
    beta = beta.astype(jnp.float32)
    gamma = gamma.astype(jnp.float32)
    # FiLM per the module's argument swap: out = beta * bn(z) + gamma
    scale = beta * (params["bn_w"] * inv)[None, :]                                  # (N, Cout)
    bias = beta * (params["bn_b"] - mean * params["bn_w"] * inv)[None, :] + gamma   # (N, Cout)
    scale_slab = jnp.tile(scale, (1, W)).reshape(N, 1, WC)
    bias_slab = jnp.tile(bias, (1, W)).reshape(N, 1, WC)

    # ---- pass 2: fused normalize / FiLM / ReLU / residual (full-H blocks) ---
    # input_output_aliases onto z_full is skipped on purpose: the intermediates
    # are bf16 while the final output stays f32, so dtypes don't match.
    p2_blocks = [((NB, H, WC), ACT_DTYPE), ((NB, H, WC), ACT_DTYPE),
                 ((NB, 1, WC), jnp.float32), ((NB, 1, WC), jnp.float32),
                 ((NB, H, WC), jnp.float32)]
    out_slab = pl.pallas_call(
        _bn_film_residual_kernel,
        out_shape=jax.ShapeDtypeStruct((N, H, WC), jnp.float32),
        grid=(nblk,),
        in_specs=[
            pl.BlockSpec((NB, H, WC), lambda n: (n, 0, 0)),
            pl.BlockSpec((NB, H, WC), lambda n: (n, 0, 0)),
            pl.BlockSpec((NB, 1, WC), lambda n: (n, 0, 0)),
            pl.BlockSpec((NB, 1, WC), lambda n: (n, 0, 0)),
        ],
        out_specs=pl.BlockSpec((NB, H, WC), lambda n: (n, 0, 0)),
        compiler_params=pltpu.CompilerParams(
            dimension_semantics=("parallel",),
            vmem_limit_bytes=_vmem_limit(p2_blocks)),
    )(z_full, h_full, scale_slab, bias_slab)

    return out_slab


def resblock_forward(x_nchw, beta, gamma, params):
    """PyTorch-compatible wrapper. x_nchw: (N, Cin, H, W); beta/gamma: (N, Cout).

    The NCHW<->slab transposes here are pure layout plumbing; a model that keeps
    its activations in slab/NHWC layout should call resblock_forward_slab.
    """
    N, Cin, H, W = x_nchw.shape
    Cout = params["bn_w"].shape[0]
    x_slab = jnp.transpose(x_nchw, (0, 2, 3, 1)).reshape(N, H, W * Cin)
    out_slab = resblock_forward_slab(x_slab, beta, gamma, params)
    return jnp.transpose(out_slab.reshape(N, H, W, Cout), (0, 3, 1, 2))


# ---------------------------- pure-JAX reference -----------------------------
def ref_resblock(x, beta, gamma, w1_oihw, b1, w2_oihw, b2, bn_w, bn_b):
    dn = ("NCHW", "OIHW", "NCHW")
    y = jax.lax.conv_general_dilated(x, w1_oihw, (1, 1), "VALID",
                                     dimension_numbers=dn)
    y = jnp.maximum(y + b1[None, :, None, None], 0.0)
    identity = y
    z = jax.lax.conv_general_dilated(y, w2_oihw, (1, 1), ((1, 1), (1, 1)),
                                     dimension_numbers=dn)
    z = z + b2[None, :, None, None]
    mean = z.mean(axis=(0, 2, 3), keepdims=True)
    var = ((z - mean) ** 2).mean(axis=(0, 2, 3), keepdims=True)
    z = (z - mean) / jnp.sqrt(var + EPS)
    z = z * bn_w[None, :, None, None] + bn_b[None, :, None, None]
    z = beta[:, :, None, None] * z + gamma[:, :, None, None]
    return jnp.maximum(z, 0.0) + identity


if __name__ == "__main__":
    N, Cin, Cout, H, W = 2, 4, 8, 16, 16

    key = jax.random.PRNGKey(0)
    ks = jax.random.split(key, 9)
    x = jax.random.normal(ks[0], (N, Cin, H, W), jnp.float32)
    beta = jax.random.normal(ks[1], (N, Cout), jnp.float32)
    gamma = jax.random.normal(ks[2], (N, Cout), jnp.float32)

    # Deterministic "module parameters" (shapes from ResBlock.__init__).
    w1_oihw = jax.random.normal(ks[3], (Cout, Cin, 1, 1), jnp.float32) * 0.3
    b1 = jax.random.normal(ks[4], (Cout,), jnp.float32) * 0.1
    w2_oihw = jax.random.normal(ks[5], (Cout, Cout, 3, 3), jnp.float32) * 0.1
    b2 = jax.random.normal(ks[6], (Cout,), jnp.float32) * 0.1
    bn_w = jax.random.normal(ks[7], (Cout,), jnp.float32) * 0.2 + 1.0
    bn_b = jax.random.normal(ks[8], (Cout,), jnp.float32) * 0.1

    params = prepare_resblock_params(w1_oihw, b1, w2_oihw, b2, bn_w, bn_b, W=W)

    out = resblock_forward(x, beta, gamma, params)
    out = jax.block_until_ready(out)

    ref = ref_resblock(x, beta, gamma, w1_oihw, b1, w2_oihw, b2, bn_w, bn_b)
    full_f32 = (MXU_DTYPE == jnp.float32) and (ACT_DTYPE == jnp.float32)
    tol = 2e-4 if full_f32 else 5e-2
    np.testing.assert_allclose(np.asarray(out), np.asarray(ref), rtol=tol, atol=tol)

    print("KERNEL_OK")
</pallas_src>

<mosaic_0001>
module attributes {stable_mosaic.version = 11 : i64} {
  func.func @_conv_stats_kernel(%arg0: i32, %arg1: memref<2x16x64xbf16, #tpu.memory_space<vmem>>, %arg2: memref<64x128xbf16, #tpu.memory_space<vmem>>, %arg3: memref<1x128xf32, #tpu.memory_space<vmem>>, %arg4: memref<3x128x128xbf16, #tpu.memory_space<vmem>>, %arg5: memref<2x16x128xbf16, #tpu.memory_space<vmem>>, %arg6: memref<2x16x128xbf16, #tpu.memory_space<vmem>>, %arg7: memref<1x2x128xf32, #tpu.memory_space<vmem>>) attributes {dimension_semantics = [#tpu.dimension_semantics<parallel>], iteration_bounds = array<i64: 1>, scalar_prefetch = 0 : i64, scratch_operands = 0 : i64, tpu.core_type = #tpu.core_type<tc>, window_params = [{transform_indices = @transform_0, window_bounds = array<i64: 2, 16, 64>}, {pipeline_mode = #tpu.pipeline_mode<synchronous>, transform_indices = @transform_1, window_bounds = array<i64: 64, 128>}, {pipeline_mode = #tpu.pipeline_mode<synchronous>, transform_indices = @transform_2, window_bounds = array<i64: 1, 128>}, {pipeline_mode = #tpu.pipeline_mode<synchronous>, transform_indices = @transform_3, window_bounds = array<i64: 3, 128, 128>}, {transform_indices = @transform_4, window_bounds = array<i64: 2, 16, 128>}, {transform_indices = @transform_5, window_bounds = array<i64: 2, 16, 128>}, {transform_indices = @transform_6, window_bounds = array<i64: 1, 2, 128>}]} {
    %c0 = arith.constant 0 : index
    %c0_0 = arith.constant 0 : index
    %c0_1 = arith.constant 0 : index
    %0 = vector.load %arg1[%c0, %c0_0, %c0_1] : memref<2x16x64xbf16, #tpu.memory_space<vmem>>, vector<2x16x64xbf16>
    %1 = vector.shape_cast %0 : vector<2x16x64xbf16> to vector<32x64xbf16>
    %c0_2 = arith.constant 0 : index
    %c0_3 = arith.constant 0 : index
    %2 = vector.load %arg2[%c0_2, %c0_3] : memref<64x128xbf16, #tpu.memory_space<vmem>>, vector<64x128xbf16>
    %cst = arith.constant dense<0.000000e+00> : vector<32x128xf32>
    %3 = tpu.matmul %1, %2, %cst {dimension_numbers = #tpu.dot_dimension_numbers<[1], [0], [0], [1], [0, 0, 1, 1], [], []>} : vector<32x64xbf16>, vector<64x128xbf16>, vector<32x128xf32> -> vector<32x128xf32>
    %c0_4 = arith.constant 0 : index
    %c0_5 = arith.constant 0 : index
    %4 = vector.load %arg3[%c0_4, %c0_5] : memref<1x128xf32, #tpu.memory_space<vmem>>, vector<1x128xf32>
    %5 = vector.broadcast %4 : vector<1x128xf32> to vector<32x128xf32>
    %6 = arith.addf %3, %5 : vector<32x128xf32>
    %cst_6 = arith.constant 0.000000e+00 : f32
    %7 = vector.broadcast %cst_6 : f32 to vector<32x128xf32>
    %8 = arith.maximumf %6, %7 : vector<32x128xf32>
    %9 = vector.shape_cast %8 : vector<32x128xf32> to vector<2x16x128xf32>
    %10 = arith.truncf %9 : vector<2x16x128xf32> to vector<2x16x128xbf16>
    %c0_7 = arith.constant 0 : index
    %c0_8 = arith.constant 0 : index
    %c0_9 = arith.constant 0 : index
    %11 = vector.load %arg5[%c0_7, %c0_8, %c0_9] : memref<2x16x128xbf16, #tpu.memory_space<vmem>>, vector<2x16x128xbf16>
    tpu.vector_store %arg5[%c0_7, %c0_8, %c0_9], %10 {strides = array<i32>} : memref<2x16x128xbf16, #tpu.memory_space<vmem>>, vector<2x16x128xbf16>,
    %cst_10 = arith.constant 0.000000e+00 : f32
    %12 = vector.broadcast %cst_10 : f32 to vector<2x1x128xf32>
    %13 = vector.extract_strided_slice %9 {offsets = [0, 0, 0], sizes = [2, 15, 128], strides = [1, 1, 1]} : vector<2x16x128xf32> to vector<2x15x128xf32>
    %14 = tpu.concatenate %12, %13 in 1 : vector<2x1x128xf32>, vector<2x15x128xf32> -> vector<2x16x128xf32>
    %15 = vector.extract_strided_slice %9 {offsets = [0, 1, 0], sizes = [2, 15, 128], strides = [1, 1, 1]} : vector<2x16x128xf32> to vector<2x15x128xf32>
    %16 = tpu.concatenate %15, %12 in 1 : vector<2x15x128xf32>, vector<2x1x128xf32> -> vector<2x16x128xf32>
    %17 = arith.truncf %9 : vector<2x16x128xf32> to vector<2x16x128xbf16>
    %18 = vector.shape_cast %17 : vector<2x16x128xbf16> to vector<32x128xbf16>
    %19 = arith.truncf %14 : vector<2x16x128xf32> to vector<2x16x128xbf16>
    %20 = vector.shape_cast %19 : vector<2x16x128xbf16> to vector<32x128xbf16>
    %21 = arith.truncf %16 : vector<2x16x128xf32> to vector<2x16x128xbf16>
    %22 = vector.shape_cast %21 : vector<2x16x128xbf16> to vector<32x128xbf16>
    %c0_11 = arith.constant 0 : index
    %c0_12 = arith.constant 0 : index
    %c0_13 = arith.constant 0 : index
    %23 = vector.load %arg4[%c0_11, %c0_12, %c0_13] : memref<3x128x128xbf16, #tpu.memory_space<vmem>>, vector<1x128x128xbf16>
    %24 = vector.shape_cast %23 : vector<1x128x128xbf16> to vector<128x128xbf16>
    %cst_14 = arith.constant dense<0.000000e+00> : vector<32x128xf32>
    %25 = tpu.matmul %20, %24, %cst_14 {dimension_numbers = #tpu.dot_dimension_numbers<[1], [0], [0], [1], [0, 0, 1, 1], [], []>} : vector<32x128xbf16>, vector<128x128xbf16>, vector<32x128xf32> -> vector<32x128xf32>
    %c1 = arith.constant 1 : index
    %c0_15 = arith.constant 0 : index
    %c0_16 = arith.constant 0 : index
    %26 = vector.load %arg4[%c1, %c0_15, %c0_16] : memref<3x128x128xbf16, #tpu.memory_space<vmem>>, vector<1x128x128xbf16>
    %27 = vector.shape_cast %26 : vector<1x128x128xbf16> to vector<128x128xbf16>
    %cst_17 = arith.constant dense<0.000000e+00> : vector<32x128xf32>
    %28 = tpu.matmul %18, %27, %cst_17 {dimension_numbers = #tpu.dot_dimension_numbers<[1], [0], [0], [1], [0, 0, 1, 1], [], []>} : vector<32x128xbf16>, vector<128x128xbf16>, vector<32x128xf32> -> vector<32x128xf32>
    %29 = arith.addf %25, %28 : vector<32x128xf32>
    %c2 = arith.constant 2 : index
    %c0_18 = arith.constant 0 : index
    %c0_19 = arith.constant 0 : index
    %30 = vector.load %arg4[%c2, %c0_18, %c0_19] : memref<3x128x128xbf16, #tpu.memory_space<vmem>>, vector<1x128x128xbf16>
    %31 = vector.shape_cast %30 : vector<1x128x128xbf16> to vector<128x128xbf16>
    %cst_20 = arith.constant dense<0.000000e+00> : vector<32x128xf32>
    %32 = tpu.matmul %22, %31, %cst_20 {dimension_numbers = #tpu.dot_dimension_numbers<[1], [0], [0], [1], [0, 0, 1, 1], [], []>} : vector<32x128xbf16>, vector<128x128xbf16>, vector<32x128xf32> -> vector<32x128xf32>
    %33 = arith.addf %29, %32 : vector<32x128xf32>
    %34 = vector.shape_cast %33 : vector<32x128xf32> to vector<2x16x128xf32>
    %35 = arith.truncf %34 : vector<2x16x128xf32> to vector<2x16x128xbf16>
    %c0_21 = arith.constant 0 : index
    %c0_22 = arith.constant 0 : index
    %c0_23 = arith.constant 0 : index
    %36 = vector.load %arg6[%c0_21, %c0_22, %c0_23] : memref<2x16x128xbf16, #tpu.memory_space<vmem>>, vector<2x16x128xbf16>
    tpu.vector_store %arg6[%c0_21, %c0_22, %c0_23], %35 {strides = array<i32>} : memref<2x16x128xbf16, #tpu.memory_space<vmem>>, vector<2x16x128xbf16>,
    %cst_24 = arith.constant dense<0.000000e+00> : vector<128xf32>
    %37 = vector.multi_reduction <add>, %33, %cst_24 [0] : vector<32x128xf32> to vector<128xf32>
    %38 = vector.shape_cast %37 : vector<128xf32> to vector<1x128xf32>
    %39 = arith.mulf %33, %33 : vector<32x128xf32>
    %cst_25 = arith.constant dense<0.000000e+00> : vector<128xf32>
    %40 = vector.multi_reduction <add>, %39, %cst_25 [0] : vector<32x128xf32> to vector<128xf32>
    %41 = vector.shape_cast %40 : vector<128xf32> to vector<1x128xf32>
    %42 = tpu.concatenate %38, %41 in 0 : vector<1x128xf32>, vector<1x128xf32> -> vector<2x128xf32>
    %c0_26 = arith.constant 0 : index
    %c0_27 = arith.constant 0 : index
    %c0_28 = arith.constant 0 : index
    %43 = vector.load %arg7[%c0_26, %c0_27, %c0_28] : memref<1x2x128xf32, #tpu.memory_space<vmem>>, vector<1x2x128xf32>
    %44 = vector.shape_cast %43 : vector<1x2x128xf32> to vector<2x128xf32>
    %45 = vector.shape_cast %42 : vector<2x128xf32> to vector<1x2x128xf32>
    tpu.vector_store %arg7[%c0_26, %c0_27, %c0_28], %45 {strides = array<i32>} : memref<1x2x128xf32, #tpu.memory_space<vmem>>, vector<1x2x128xf32>,
    return
  }
  func.func @transform_0(%arg0: i32) -> (i32, i32, i32) {
    %c0_i32 = arith.constant 0 : i32
    %c0_i32_0 = arith.constant 0 : i32
    %c0_i32_1 = arith.constant 0 : i32
    return %arg0, %c0_i32, %c0_i32_0 : i32, i32, i32
  }
  func.func @transform_1(%arg0: i32) -> (i32, i32) {
    %c0_i32 = arith.constant 0 : i32
    %c0_i32_0 = arith.constant 0 : i32
    %c0_i32_1 = arith.constant 0 : i32
    return %c0_i32, %c0_i32_0 : i32, i32
  }
  func.func @transform_2(%arg0: i32) -> (i32, i32) {
    %c0_i32 = arith.constant 0 : i32
    %c0_i32_0 = arith.constant 0 : i32
    %c0_i32_1 = arith.constant 0 : i32
    return %c0_i32, %c0_i32_0 : i32, i32
  }
  func.func @transform_3(%arg0: i32) -> (i32, i32, i32) {
    %c0_i32 = arith.constant 0 : i32
    %c0_i32_0 = arith.constant 0 : i32
    %c0_i32_1 = arith.constant 0 : i32
    %c0_i32_2 = arith.constant 0 : i32
    return %c0_i32, %c0_i32_0, %c0_i32_1 : i32, i32, i32
  }
  func.func @transform_4(%arg0: i32) -> (i32, i32, i32) {
    %c0_i32 = arith.constant 0 : i32
    %c0_i32_0 = arith.constant 0 : i32
    %c0_i32_1 = arith.constant 0 : i32
    return %arg0, %c0_i32, %c0_i32_0 : i32, i32, i32
  }
  func.func @transform_5(%arg0: i32) -> (i32, i32, i32) {
    %c0_i32 = arith.constant 0 : i32
    %c0_i32_0 = arith.constant 0 : i32
    %c0_i32_1 = arith.constant 0 : i32
    return %arg0, %c0_i32, %c0_i32_0 : i32, i32, i32
  }
  func.func @transform_6(%arg0: i32) -> (i32, i32, i32) {
    %c0_i32 = arith.constant 0 : i32
    %c0_i32_0 = arith.constant 0 : i32
    %c0_i32_1 = arith.constant 0 : i32
    return %arg0, %c0_i32, %c0_i32_0 : i32, i32, i32
  }
}

</mosaic_0001>

<bundles_post_ra>
// kernel: tpu_custom_call.1
= control target key start
LH: loop header
LB: loop body
LE: loop exit
PB: predicated region body
PF: predicated region fallthrough
CT: control target
= control target key end

     0   :  { %12 = vsyncpa [#allocation3], 0  ;;  %s1205_s0 = inlined_call_operand.hbm [shape: bf16[2,16,64], index: 0, kind: input, shape index: {}]   ;;  %s1206_s1 = inlined_call_operand.hbm [shape: bf16[64,128], index: 1, kind: input, shape index: {}]   ;;  %s1207_s2 = inlined_call_operand.vmem [shape: f32[1,128], index: 2, kind: input, shape index: {}]   ;;  %s1208_s3 = inlined_call_operand.hbm [shape: bf16[3,128,128], index: 3, kind: input, shape index: {}]   ;;  %s1209_s4 = inlined_call_operand.hbm [shape: bf16[2,16,128], index: 4, kind: output, shape index: {0}]   ;;  %s1210_s5 = inlined_call_operand.hbm [shape: bf16[2,16,128], index: 5, kind: output, shape index: {1}]   ;;  %s1211_s6 = inlined_call_operand.hbm [shape: f32[1,2,128], index: 6, kind: output, shape index: {2}]  }
   0x1   :  { %13 = vsyncpa [#allocation6], 0 }
   0x2   :  { %14 = vsyncpa [#allocation4], 0 }
   0x3   :  { %15 = vsyncpa [#allocation10], 0  ;;  %s1047_s21 = smov [#allocation5]   ;;  %s1048_s23 = smov [#allocation2]  }
   0x4   :  { %s33_s22 = sshll.u32 %s1047_s21, 4  ;;  %s21_s24 = sshll.u32 %s1048_s23, 4  ;;  %s34_s22 = int_to_ptr.vmem [resolvable:$true] %s33_s22  ;;  %s1091_s24 = int_to_ptr.vmem [resolvable:$true] %s21_s24 }
   0x5   :  { %s907_s27 = scalar_lea.hbm %s1206_s1, 512 }
   0x6   :  { %p908_p0 = scmp.ne.s32.totalorder %s1206_s1, %s907_s27  ;;  %p911_p1 = scmp.lt.u32.totalorder %s907_s27, %s1206_s1 }
   0x8   :  { %p913_p2 = pnand %p911_p1, %p908_p0 }
   0xa   :  { %916 = shalt.err (!%p913_p2)
}
   0xb   :  { %s917_s8 = scalar_lea.vmem %s34_s22, 512  ;;  %p922_p4 = scmp.lt.s32.totalorder %s34_s22, %s34_s22 }
   0xc   :  { %p918_p3 = scmp.ne.s32.totalorder %s34_s22, %s917_s8  ;;  %p923_p5 = scmp.lt.s32.totalorder %s917_s8, %s917_s8 }
   0xe   :  { %p924_p6 = por %p923_p5, %p922_p4 }
  0x10   :  { %p925_p7 = pnand %p924_p6, %p918_p3 }
  0x12   :  { %928 = shalt.err (!%p925_p7)
}
  0x13   :  { %s1049_s9 = smov 64   ;;  %s1050_s10 = smov 4  }
  0x14   :  { %39 = dma.hbm_to_vmem [thread:$0]  %s1206_s1, 512, %s34_s22, [#allocation6], %s1049_s9, %s1049_s9, %s1050_s10  }
  0x15   :  { %s929_s15 = scalar_lea.hbm %s1205_s0, 256 }
  0x16   :  { %p930_p8 = scmp.ne.s32.totalorder %s1205_s0, %s929_s15  ;;  %p933_p9 = scmp.lt.u32.totalorder %s929_s15, %s1205_s0 }
  0x18   :  { %p935_p10 = pnand %p933_p9, %p930_p8 }
  0x1a   :  { %938 = shalt.err (!%p935_p10)
}
  0x1b   :  { %s939_s20 = scalar_lea.vmem %s1091_s24, 256  ;;  %p944_p12 = scmp.lt.s32.totalorder %s1091_s24, %s1091_s24 }
  0x1c   :  { %p940_p11 = scmp.ne.s32.totalorder %s1091_s24, %s939_s20  ;;  %p945_p13 = scmp.lt.s32.totalorder %s939_s20, %s939_s20 }
  0x1e   :  { %p946_p0 = por %p945_p13, %p944_p12 }
  0x20   :  { %p947_p1 = pnand %p946_p0, %p940_p11 }
  0x22   :  { %950 = shalt.err (!%p947_p1)
}
  0x23   :  { %27 = dma.hbm_to_vmem [thread:$0]  %s1205_s0, 256, %s1091_s24, [#allocation3], %s1049_s9, %s1049_s9, %s1050_s10  }
  0x24   :  { %s1051_s22 = smov [#allocation7]   ;;  %s951_s27 = scalar_lea.hbm %s1208_s3, 3072 }
  0x25   :  { %s47_s23 = sshll.u32 %s1051_s22, 4  ;;  %p952_p2 = scmp.ne.s32.totalorder %s1208_s3, %s951_s27  ;;  %s48_s23 = int_to_ptr.vmem [resolvable:$true] %s47_s23 }
  0x26   :  { %p955_p3 = scmp.lt.u32.totalorder %s951_s27, %s1208_s3 }
  0x28   :  { %p957_p4 = pnand %p955_p3, %p952_p2 }
  0x2a   :  { %960 = shalt.err (!%p957_p4)
}
  0x2b   :  { %s961_s8 = scalar_lea.vmem %s48_s23, 3072  ;;  %p966_p6 = scmp.lt.s32.totalorder %s48_s23, %s48_s23 }
  0x2c   :  { %p962_p5 = scmp.ne.s32.totalorder %s48_s23, %s961_s8  ;;  %p967_p7 = scmp.lt.s32.totalorder %s961_s8, %s961_s8 }
  0x2e   :  { %p968_p8 = por %p967_p7, %p966_p6 }
  0x30   :  { %p969_p9 = pnand %p968_p8, %p962_p5 }
  0x32   :  { %972 = shalt.err (!%p969_p9)
}
  0x33   :  { %53 = dma.hbm_to_vmem [thread:$0]  %s1208_s3, 3072, %s48_s23, [#allocation6], %s1049_s9, %s1049_s9, %s1050_s10  }
  0x34   :  { %1039 = dma.done.wait [#allocation3], 256  }
  0x35   :  { %1040 = vsyncadd [#allocation3], 4294967040 }
  0x36   :  { %1041 = dma.done.wait [#allocation6], 3584  }
  0x37   :  { %1042 = vsyncadd [#allocation6], 4294963712  ;;  %v877_v0 = vld [vmem:[#allocation5] sm:$0xff]   ;;  %v878_v1 = vld [vmem:[#allocation5 + $0x8] sm:$0xff]   ;;  %vm117_vm0 = vcmask 523264   ;;  %vm201_vm1 = vcmask 1040384  }
  0x38   :  { %788 = vmatprep.subr.bf16.mxu0 %v877_v0  ;;  %v879_v2 = vld [vmem:[#allocation5 + $0x10] sm:$0xff]   ;;  %v884_v4 = vld [vmem:[#allocation7] sm:$0xff]   ;;  %v880_v5 = vld [vmem:[#allocation5 + $0x18] sm:$0xff]   ;;  %vm214_vm2 = vcmask 1046528   ;;  %vm1052_vm4 = vmmov 1  }
  0x39   :  { %789 = vmatpush3.bf16.msra.mxu0 %v877_v0  ;;  %v881_v3 = vld [vmem:[#allocation2] sm:$0xff]   ;;  %820 = vmatprep.subr.bf16.mxu1 %v884_v4  ;;  %v886_v6 = vld [vmem:[#allocation7 + $0x8] sm:$0xff]   ;;  %v883_v8 = vld [vmem:[#allocation7 + $0x40] sm:$0xff]  }
  0x3a   :  { %790 = vmatprep.subr.bf16.mxu0 %v878_v1  ;;  %796 = vmatprep.mubr.msk.bf16.mxu0 %vm117_vm0, %v881_v3  ;;  %v888_v7 = vld [vmem:[#allocation7 + $0x10] sm:$0xff]   ;;  %v882_v9 = vld [vmem:[#allocation2 + $0x8] sm:$0xff]   ;;  %v885_v11 = vld [vmem:[#allocation7 + $0x48] sm:$0xff]  }
  0x3b   :  { %821 = vmatpush3.bf16.msra.mxu1 %v884_v4  ;;  %v890_v10 = vld [vmem:[#allocation7 + $0x18] sm:$0xff]   ;;  %v892_v12 = vld [vmem:[#allocation7 + $0x20] sm:$0xff]   ;;  %v887_v13 = vld [vmem:[#allocation7 + $0x50] sm:$0xff]  }
  0x3c   :  { %822 = vmatprep.subr.bf16.mxu1 %v886_v6  ;;  %v889_v14 = vld [vmem:[#allocation7 + $0x58] sm:$0xff]   ;;  %v891_v15 = vld [vmem:[#allocation7 + $0x60] sm:$0xff]   ;;  %v893_v16 = vld [vmem:[#allocation7 + $0x68] sm:$0xff]  }
  0x3d   :  { %791 = vmatpush3.bf16.msra.mxu0 %v878_v1  ;;  %v894_v17 = vld [vmem:[#allocation7 + $0x28] sm:$0xff]   ;;  %v895_v18 = vld [vmem:[#allocation7 + $0x70] sm:$0xff]   ;;  %v897_v20 = vld [vmem:[#allocation7 + $0x78] sm:$0xff]  }
  0x3e   :  { %792 = vmatprep.subr.bf16.mxu0 %v879_v2  ;;  %v896_v19 = vld [vmem:[#allocation7 + $0x30] sm:$0xff]   ;;  %v898_v21 = vld [vmem:[#allocation7 + $0x38] sm:$0xff]   ;;  %v899_v22 = vld [vmem:[#allocation7 + $0x80] sm:$0xff]  }
  0x3f   :  { %823 = vmatpush3.bf16.msra.mxu1 %v886_v6  ;;  %v667_v23 = vld [vmem:[%s1207_s2] ss:$0 sm:$0xff]  ;;  %vm696_vm3 = vmneg %vm201_vm1  ;;  %v900_v55 = vld [vmem:[#allocation7 + $0x88] sm:$0xff]   ;;  %s1053_s2 = smov [#allocation8]  }
  0x40   :  { %824 = vmatprep.subr.bf16.mxu1 %v888_v7  ;;  %vm697_vm5 = vmpackc.low %vm1052_vm4, %vm696_vm3  ;;  %v901_v56 = vld [vmem:[#allocation7 + $0x90] sm:$0xff]   ;;  %v902_v57 = vld [vmem:[#allocation7 + $0x98] sm:$0xff]   ;;  %s625_s12 = sshll.u32 %s1053_s2, 4  ;;  %s626_s12 = int_to_ptr.vmem [resolvable:$true] %s625_s12 }
  0x41   :  { %793 = vmatpush3.bf16.msra.mxu0 %v879_v2  ;;  %vm1154_vm6 = vmpackc.low %vm214_vm2, %vm1052_vm4  ;;  %v903_v58 = vld [vmem:[#allocation7 + $0xa0] sm:$0xff]   ;;  %v904_v59 = vld [vmem:[#allocation7 + $0xa8] sm:$0xff]   ;;  %s973_s13 = scalar_lea.vmem %s626_s12, 256  ;;  %p978_p11 = scmp.lt.s32.totalorder %s626_s12, %s626_s12 }
  0x42   :  { %794 = vmatprep.subr.bf16.mxu0 %v880_v5  ;;  %v905_v60 = vld [vmem:[#allocation7 + $0xb0] sm:$0xff]   ;;  %v906_v61 = vld [vmem:[#allocation7 + $0xb8] sm:$0xff]   ;;  %p974_p10 = scmp.ne.s32.totalorder %s626_s12, %s973_s13  ;;  %p979_p12 = scmp.lt.s32.totalorder %s973_s13, %s973_s13 }
  0x43   :  { %825 = vmatpush3.bf16.msra.mxu1 %v888_v7 }
  0x44   :  { %826 = vmatprep.subr.bf16.mxu1 %v890_v10  ;;  %p980_p13 = por %p979_p12, %p978_p11 }
  0x45   :  { %795 = vmatpush3.bf16.msra.mxu0 %v880_v5 }
  0x46   :  { %800 = vmatprep.subr.bf16.mxu0 %v883_v8  ;;  %p981_p0 = pnand %p980_p13, %p974_p10 }
  0x47   :  { %827 = vmatpush3.bf16.msra.mxu1 %v890_v10 }
  0x48   :  { %797 = vmatmul.mubr.msk.bf16.vlgmr.msra.gmra.mrb[0].mxu0 %vm117_vm0, %v882_v9  ;;  %828 = vmatprep.subr.bf16.mxu1 %v892_v12 }
  0x49   :  { %801 = vmatpush3.bf16.msra.mxu0 %v883_v8 }
  0x4a   :  { %802 = vmatprep.subr.bf16.mxu0 %v885_v11 }
  0x4b   :  { %829 = vmatpush3.bf16.msra.mxu1 %v892_v12 }
  0x4c   :  { %830 = vmatprep.subr.bf16.mxu1 %v894_v17 }
  0x4d   :  { %803 = vmatpush3.bf16.msra.mxu0 %v885_v11 }
  0x4e   :  { %804 = vmatprep.subr.bf16.mxu0 %v887_v13 }
  0x4f   :  { %831 = vmatpush3.bf16.msra.mxu1 %v894_v17 }
  0x50   :  { %832 = vmatprep.subr.bf16.mxu1 %v896_v19 }
  0x51   :  { %805 = vmatpush3.bf16.msra.mxu0 %v887_v13 }
  0x52   :  { %806 = vmatprep.subr.bf16.mxu0 %v889_v14 }
  0x53   :  { %833 = vmatpush3.bf16.msra.mxu1 %v896_v19 }
  0x54   :  { %834 = vmatprep.subr.bf16.mxu1 %v898_v21 }
  0x55   :  { %807 = vmatpush3.bf16.msra.mxu0 %v889_v14 }
  0x56   :  { %808 = vmatprep.subr.bf16.mxu0 %v891_v15 }
  0x57   :  { %835 = vmatpush3.bf16.msra.mxu1 %v898_v21 }
  0x58   :  { %840 = vmatprep.subr.bf16.mxu1 %v899_v22 }
  0x59   :  { %809 = vmatpush3.bf16.msra.mxu0 %v891_v15 }
  0x5a   :  { %810 = vmatprep.subr.bf16.mxu0 %v893_v16 }
  0x5d   :  { %811 = vmatpush3.bf16.msra.mxu0 %v893_v16 }
  0x5e   :  { %812 = vmatprep.subr.bf16.mxu0 %v895_v18 }
  0x61   :  { %813 = vmatpush3.bf16.msra.mxu0 %v895_v18 }
  0x62   :  { %814 = vmatprep.subr.bf16.mxu0 %v897_v20 }
  0x65   :  { %815 = vmatpush3.bf16.msra.mxu0 %v897_v20 }
 0x11b   :  { %v798_v24 = vpop.f32.mrb[0].mxu0 }
 0x11c   :  { %v167_v25 = vadd.f32 %v798_v24, %v667_v23  ;;  %v158_v26 = vpop.f32.mrb[1].mxu0 }
 0x11d   :  { %v159_v27 = vadd.f32 %v667_v23, %v158_v26  ;;  %v799_v28 = vpop.f32.mrb[2].mxu0 }
 0x11e   :  { %v175_v29 = vmax.f32 %v167_v25, 0.0  ;;  %v170_v30 = vadd.f32 %v799_v28, %v667_v23  ;;  %v161_v31 = vpop.f32.mrb[3].mxu0 }
 0x11f   :  { %v173_v32 = vmax.f32 %v159_v27, 0.0  ;;  %v162_v33 = vadd.f32 %v667_v23, %v161_v31 }
 0x120   :  { %v176_v34 = vmax.f32 %v170_v30, 0.0  ;;  %v205_v35 = vrot.slane %v175_v29, 7  ;;  %v218_v36 = vrot.slane %v175_v29, 1 }
 0x121   :  { %v174_v37 = vmax.f32 %v162_v33, 0.0  ;;  %v215_v38 = vrot.slane %v173_v32, 1  ;;  %v202_v45 = vrot.slane %v173_v32, 7 }
 0x122   :  { %v178_v39 = vpack.c.bf16 %v176_v34, %v175_v29  ;;  %v206_v40 = vrot.slane %v176_v34, 7  ;;  %v219_v41 = vrot.slane %v176_v34, 1 }
 0x123   :  { %v203_v42 = vrot.slane %v174_v37, 7  ;;  %v216_v43 = vrot.slane %v174_v37, 1  ;;  %v177_v44 = vpack.c.bf16 %v174_v37, %v173_v32 }
 0x124   :  { %750 = vst [vmem:[#allocation8 + $0x8] sm:$0xff] %v178_v39   ;;  %v220_v46 = vsel %vm214_vm2, %v218_v36, %v219_v41  ;;  %v207_v47 = vsel %vm201_vm1, %v205_v35, %v206_v40 }
 0x125   :  { %816 = vmatprep.mubr.bf16.mxu0 %v177_v44  ;;  %734 = vst [vmem:[#allocation8] sm:$0xff] %v177_v44   ;;  %v204_v48 = vsel %vm201_vm1, %v202_v45, %v203_v42  ;;  %v217_v49 = vsel %vm214_vm2, %v215_v38, %v216_v43  ;;  %v716_v50 = vpack.c.bf16 %v219_v41, %v220_v46 }
 0x126   :  { %v702_v51 = vpack.c.bf16 %v207_v47, %v205_v35  ;;  %817 = vmatmul.mubr.bf16.vlgmr.msra.gmra.mrb[4].mxu0 %v178_v39  ;;  %v698_v52 = vpack.c.bf16 %v204_v48, %v202_v45  ;;  %v713_v53 = vpack.c.bf16 %v216_v43, %v217_v49 }
 0x128   :  { %836 = vmatprep.mubr.msk.bf16.mxu1 %vm697_vm5, %v698_v52 }
 0x129   :  { %837 = vmatmul.mubr.msk.bf16.vlgmr.msra.gmra.mrb[0].mxu1 %vm697_vm5, %v702_v51 }
 0x12a   :  { %841 = vmatpush3.bf16.msra.mxu1 %v899_v22  ;;  %856 = vmatprep.mubr.msk.bf16.mxu1 %vm1154_vm6, %v713_v53 }
 0x12b   :  { %842 = vmatprep.subr.bf16.mxu1 %v900_v55 }
 0x12e   :  { %843 = vmatpush3.bf16.msra.mxu1 %v900_v55 }
 0x12f   :  { %844 = vmatprep.subr.bf16.mxu1 %v901_v56 }
 0x132   :  { %845 = vmatpush3.bf16.msra.mxu1 %v901_v56 }
 0x133   :  { %846 = vmatprep.subr.bf16.mxu1 %v902_v57 }
 0x136   :  { %847 = vmatpush3.bf16.msra.mxu1 %v902_v57 }
 0x137   :  { %848 = vmatprep.subr.bf16.mxu1 %v903_v58 }
 0x13a   :  { %849 = vmatpush3.bf16.msra.mxu1 %v903_v58 }
 0x13b   :  { %850 = vmatprep.subr.bf16.mxu1 %v904_v59 }
 0x13e   :  { %851 = vmatpush3.bf16.msra.mxu1 %v904_v59 }
 0x13f   :  { %852 = vmatprep.subr.bf16.mxu1 %v905_v60 }
 0x142   :  { %853 = vmatpush3.bf16.msra.mxu1 %v905_v60 }
 0x143   :  { %854 = vmatprep.subr.bf16.mxu1 %v906_v61 }
 0x146   :  { %855 = vmatpush3.bf16.msra.mxu1 %v906_v61 }
 0x149   :  { %857 = vmatmul.mubr.msk.bf16.vlgmr.msra.gmra.mrb[0].mxu1 %vm1154_vm6, %v716_v50 }
 0x14a   :  { %984 = shalt.err (!%p981_p0)
}
 0x14b   :  { %s985_s16 = scalar_lea.hbm %s1209_s4, 256 }
 0x14c   :  { %p986_p1 = scmp.ne.s32.totalorder %s1209_s4, %s985_s16  ;;  %p989_p2 = scmp.lt.u32.totalorder %s985_s16, %s1209_s4 }
 0x14e   :  { %p991_p3 = pnand %p989_p2, %p986_p1 }
 0x150   :  { %994 = shalt.err (!%p991_p3)
}
 0x151   :  { %631 = dma.vmem_to_hbm [thread:$0]  %s626_s12, 256, %s1209_s4, [#allocation4], %s1049_s9, %s1049_s9, %s1050_s10  }
 0x152   :  { %s1054_s22 = smov [#allocation9]  }
 0x153   :  { %s637_s23 = sshll.u32 %s1054_s22, 4  ;;  %s638_s23 = int_to_ptr.vmem [resolvable:$true] %s637_s23 }
 0x154   :  { %s995_s4 = scalar_lea.vmem %s638_s23, 256  ;;  %p1000_p5 = scmp.lt.s32.totalorder %s638_s23, %s638_s23 }
 0x155   :  { %p996_p4 = scmp.ne.s32.totalorder %s638_s23, %s995_s4  ;;  %p1001_p6 = scmp.lt.s32.totalorder %s995_s4, %s995_s4 }
 0x157   :  { %p1002_p7 = por %p1001_p6, %p1000_p5 }
 0x159   :  { %p1003_p8 = pnand %p1002_p7, %p996_p4 }
 0x1f9   :  { %v818_v62 = vpop.f32.mrb[4].mxu0 }
 0x1fa   :  { %v346_v63 = vpop.f32.mrb[5].mxu0 }
 0x1fb   :  { %v819_v0 = vpop.f32.mrb[6].mxu0 }
 0x1fc   :  { %v349_v1 = vpop.f32.mrb[7].mxu0 }
 0x21c   :  { %v858_v2 = vpop.f32.mrb[0].mxu1 }
 0x21d   :  { %v860_v3 = vadd.f32 %v858_v2, %v818_v62  ;;  %v557_v4 = vpop.f32.mrb[1].mxu1 }
 0x21e   :  { %v861_v5 = vadd.f32 %v557_v4, %v346_v63  ;;  %v859_v6 = vpop.f32.mrb[2].mxu1 }
 0x21f   :  { %v862_v7 = vadd.f32 %v859_v6, %v819_v0  ;;  %v560_v8 = vpop.f32.mrb[3].mxu1  ;;  %v607_v15 = vmul.f32 %v860_v3, %v860_v3 }
 0x220   :  { %v863_v9 = vadd.f32 %v560_v8, %v349_v1  ;;  %v605_v11 = vmul.f32 %v861_v5, %v861_v5 }
 0x221   :  { %v748_v10 = vpack.c.bf16 %v862_v7, %v860_v3 }
 0x222   :  { %v743_v12 = vpack.c.bf16 %v863_v9, %v861_v5  ;;  %v596_v13 = vadd.f32 %v863_v9, %v861_v5  ;;  %v606_v14 = vmul.f32 %v863_v9, %v863_v9 }
 0x223   :  { %751 = vst [vmem:[#allocation9 + $0x8] sm:$0xff] %v748_v10  }
 0x224   :  { %v597_v16 = vadd.f32 %v860_v3, %v596_v13  ;;  %v609_v17 = vadd.f32 %v606_v14, %v605_v11  ;;  %744 = vst [vmem:[#allocation9] sm:$0xff] %v743_v12  }
 0x225   :  { %1006 = shalt.err (!%p1003_p8)
}
 0x226   :  { %s1007_s27 = scalar_lea.hbm %s1210_s5, 256 }
 0x227   :  { %p1008_p9 = scmp.ne.s32.totalorder %s1210_s5, %s1007_s27  ;;  %p1011_p10 = scmp.lt.u32.totalorder %s1007_s27, %s1210_s5 }
 0x229   :  { %p1013_p11 = pnand %p1011_p10, %p1008_p9 }
 0x22b   :  { %1016 = shalt.err (!%p1013_p11)
}
 0x22c   :  { %643 = dma.vmem_to_hbm [thread:$0]  %s638_s23, 256, %s1210_s5, [#allocation10], %s1049_s9, %s1049_s9, %s1050_s10   ;;  %v608_v18 = vmul.f32 %v862_v7, %v862_v7  ;;  %v598_v19 = vadd.f32 %v862_v7, %v597_v16  ;;  %v610_v20 = vadd.f32 %v609_v17, %v607_v15 }
 0x22d   :  { %s1055_s24 = smov [#allocation11]  }
 0x22e   :  { %v599_v21 = vrot.slane %v598_v19, 4  ;;  %v611_v22 = vadd.f32 %v610_v20, %v608_v18  ;;  %s650_s3 = sshll.u32 %s1055_s24, 4  ;;  %s651_s3 = int_to_ptr.vmem [resolvable:$true] %s650_s3 }
 0x22f   :  { %s1017_s5 = scalar_lea.vmem %s651_s3, 32  ;;  %p1022_p13 = scmp.lt.s32.totalorder %s651_s3, %s651_s3 }
 0x230   :  { %v600_v23 = vadd.f32 %v599_v21, %v598_v19  ;;  %v612_v24 = vrot.slane %v611_v22, 4  ;;  %p1018_p12 = scmp.ne.s32.totalorder %s651_s3, %s1017_s5  ;;  %p1023_p0 = scmp.lt.s32.totalorder %s1017_s5, %s1017_s5 }
 0x232   :  { %v601_v25 = vrot.slane %v600_v23, 2  ;;  %v613_v26 = vadd.f32 %v612_v24, %v611_v22  ;;  %p1024_p1 = por %p1023_p0, %p1022_p13 }
 0x234   :  { %v602_v27 = vadd.f32 %v601_v25, %v600_v23  ;;  %v614_v28 = vrot.slane %v613_v26, 2  ;;  %p1025_p2 = pnand %p1024_p1, %p1018_p12 }
 0x236   :  { %v603_v29 = vrot.slane %v602_v27, 1  ;;  %v615_v30 = vadd.f32 %v614_v28, %v613_v26 }
 0x238   :  { %v616_v31 = vrot.slane %v615_v30, 1  ;;  %v604_v32 = vadd.f32 %v603_v29, %v602_v27 }
 0x23a   :  { %v617_v33 = vadd.f32 %v616_v31, %v615_v30 }
 0x23c   :  { %v618_v34 = vsel %vm201_vm1, %v604_v32, %v617_v33 }
 0x23d   :  { %619 = vst [vmem:[#allocation11] sm:$0x3] %v618_v34 }
 0x23e   :  { %1028 = shalt.err (!%p1025_p2)
}
 0x23f   :  { %s1029_s11 = scalar_lea.hbm %s1211_s6, 32 }
 0x240   :  { %p1030_p3 = scmp.ne.s32.totalorder %s1211_s6, %s1029_s11  ;;  %p1033_p4 = scmp.lt.u32.totalorder %s1029_s11, %s1211_s6 }
 0x242   :  { %p1035_p5 = pnand %p1033_p4, %p1030_p3 }
 0x244   :  { %1038 = shalt.err (!%p1035_p5)
}
 0x245   :  { %653 = dma.vmem_to_hbm [thread:$0]  %s651_s3, 32, %s1211_s6, [#allocation10]  }
 0x246   :  { %1043 = dma.done.wait [#allocation4], 256  }
 0x247   :  { %1044 = vsyncadd [#allocation4], 4294967040 }
 0x248   :  { %1045 = dma.done.wait [#allocation10], 288  }
 0x249   :  { %1046 = vsyncadd [#allocation10], 4294967008 }
 0x24a   :  { %663 = vsyncpa [#allocation3], 1 }
 0x24b   :  { %664 = vsyncpa [#allocation6], 1 }
 0x24c   :  { %665 = vsyncpa [#allocation4], 1 }
 0x24d   :  { %666 = vsyncpa [#allocation10], 1 }

</bundles_post_ra>
